<compile_context>
chip_gen: v6e
topology: v6e:2x2x1
jax: 0.10.0
libtpu: 0.0.40
codegen_flags: <defaults>
</compile_context>

<pallas_src>
import functools

import jax
import jax.numpy as jnp
from jax.experimental import pallas as pl
from jax.experimental.pallas import tpu as pltpu


def _dwt_kernel(x_ref, wmix_ref, o_ref, *, precision):
    # x_ref    : (1, cb, tr, 2*W)   each row = [even input row | odd input row]
    # wmix_ref : (W, W)             fused column-pair mix matrix (+-0.5 entries)
    # o_ref    : (1, 4, cb, tr, Wo) bands [LL, LH, HL, HH] for this tile
    cb = x_ref.shape[1]
    w = x_ref.shape[3] // 2
    wo = w // 2
    wmix = wmix_ref[...]

    for c in range(cb):                        # cb is a small trace-time constant
        xt = x_ref[0, c].astype(jnp.float32)   # (tr, 2W) dense read
        top = xt[:, :w]                        # even input rows
        bot = xt[:, w:]                        # odd input rows
        s = top + bot                          # row-pair sum
        d = bot - top                          # row-pair difference
        # Column-pair mixing on the MXU (the +-0.5 weights carry the /2 and signs):
        #   s @ wmix -> [ LL | HL ],   d @ wmix -> [ LH | HH ]
        rs = jnp.dot(s, wmix, preferred_element_type=jnp.float32, precision=precision)
        rd = jnp.dot(d, wmix, preferred_element_type=jnp.float32, precision=precision)
        o_ref[0, 0, c] = rs[:, :wo].astype(o_ref.dtype)   # LL
        o_ref[0, 1, c] = rd[:, :wo].astype(o_ref.dtype)   # LH
        o_ref[0, 2, c] = rs[:, wo:].astype(o_ref.dtype)   # HL
        o_ref[0, 3, c] = rd[:, wo:].astype(o_ref.dtype)   # HH


def _mix_matrix(w):
    """(W, W) f32 matrix M so that  v @ M = [ 0.5*(v[2j]+v[2j+1]) | 0.5*(v[2j+1]-v[2j]) ]."""
    wo = w // 2
    k = jnp.arange(w)[:, None]                     # input column index
    j = jnp.arange(w)[None, :]                     # output column index
    pair_idx = jnp.where(j < wo, j, j - wo)        # which column pair feeds output j
    hit = (k // 2) == pair_idx
    sign = jnp.where(j < wo, 1.0, jnp.where(k % 2 == 0, -1.0, 1.0))
    return jnp.where(hit, 0.5 * sign, 0.0).astype(jnp.float32)


def _pick_tiles(C, Ho, W, itemsize):
    """Pick (row_tile, channel_block) targeting ~2 MiB of input per grid step
    while keeping total double-buffered VMEM under ~14 MiB (v5e-safe)."""
    wmix_bytes = 2 * W * W * 4                     # constant mix matrix, double-buffered f32
    vmem_budget = 14 * 1024 * 1024
    per_row = (2 * W * itemsize) * 2 * 2           # (input + output) x double-buffering
    rows_budget = max(8, (vmem_budget - wmix_bytes) // per_row)
    if Ho <= rows_budget:
        tr = Ho                                    # full-dim block: no (8,128) constraint
        cb = int(min(C, max(1, rows_budget // max(Ho, 1)), 8))
        while C % cb:                              # keep channel blocks evenly sized
            cb -= 1
    else:
        tr = max(8, (int(rows_budget) // 8) * 8)   # multiple of 8 for the sublane dim
        cb = 1
    return tr, cb


def dwt_forward(x, *, precision=jax.lax.Precision.HIGHEST):
    """Pallas TPU equivalent of DWT.forward / dwt_init.  x: (N, C, H, W) NCHW.

    precision: matmul precision for the column mixing.  HIGHEST reproduces the
    f32 PyTorch reference to ~1e-6; on v5e (no fast f32 MXU path) pass
    jax.lax.Precision.DEFAULT for a single bf16 pass if ~1e-3 error is OK.
    """
    N, C, H, W = x.shape
    assert H % 2 == 0 and W % 2 == 0, "DWT requires even spatial dims"
    Ho, Wo = H // 2, W // 2

    # Free (contiguous) reshape: each row = [even input row | odd input row].
    xr = x.reshape(N, C, Ho, 2 * W)
    wmix = _mix_matrix(W)

    tr, cb = _pick_tiles(C, Ho, W, x.dtype.itemsize)
    grid = (N, pl.cdiv(C, cb), pl.cdiv(Ho, tr))

    # TODO(synk): for Wo < 128 a lane-dense repacking of the output slab would
    # avoid masked partial stores; skipped here to keep the layout simple.
    out = pl.pallas_call(
        functools.partial(_dwt_kernel, precision=precision),
        out_shape=jax.ShapeDtypeStruct((N, 4, C, Ho, Wo), x.dtype),
        grid=grid,
        in_specs=[
            pl.BlockSpec((1, cb, tr, 2 * W), lambda n, c, r: (n, c, r, 0)),
            # Constant block index -> DMA'd once, then reused across all steps.
            pl.BlockSpec((W, W), lambda n, c, r: (0, 0)),
        ],
        out_specs=pl.BlockSpec((1, 4, cb, tr, Wo),
                               lambda n, c, r: (n, 0, c, r, 0)),
        compiler_params=pltpu.CompilerParams(
            dimension_semantics=("parallel", "parallel", "parallel")),
    )(xr, wmix)

    # (N, 4, C, Ho, Wo) -> (N, 4C, Ho, Wo): free reshape that reproduces
    # torch.cat([LL, LH, HL, HH], dim=1) channel ordering.
    return out.reshape(N, 4 * C, Ho, Wo)


def _dwt_reference(x):
    """Pure-JAX transcription of dwt_init for a sanity check."""
    x01 = x[:, :, 0::2, :] / 2
    x02 = x[:, :, 1::2, :] / 2
    x1 = x01[:, :, :, 0::2]
    x2 = x02[:, :, :, 0::2]
    x3 = x01[:, :, :, 1::2]
    x4 = x02[:, :, :, 1::2]
    ll = x1 + x2 + x3 + x4
    lh = -x1 + x2 - x3 + x4
    hl = -x1 - x2 + x3 + x4
    hh = x1 - x2 - x3 + x4
    return jnp.concatenate([ll, lh, hl, hh], axis=1)


if __name__ == "__main__":
    key = jax.random.PRNGKey(0)
    N, C, H, W = 2, 4, 16, 16
    x = jax.random.uniform(key, (N, C, H, W), jnp.float32)

    y = jax.jit(dwt_forward)(x)
    y = jax.block_until_ready(y)

    assert y.shape == (N, 4 * C, H // 2, W // 2)
    assert bool(jnp.all(jnp.isfinite(y)))

    err = float(jnp.max(jnp.abs(y - _dwt_reference(x))))
    assert err < 1e-4, f"max abs error vs reference: {err}"

    print("KERNEL_OK")
</pallas_src>

<mosaic_0001>
module attributes {stable_mosaic.version = 11 : i64} {
  func.func @_dwt_kernel(%arg0: i32, %arg1: i32, %arg2: i32, %arg3: memref<1x4x8x32xf32, #tpu.memory_space<vmem>>, %arg4: memref<16x16xf32, #tpu.memory_space<vmem>>, %arg5: memref<1x4x4x8x8xf32, #tpu.memory_space<vmem>>) attributes {dimension_semantics = [#tpu.dimension_semantics<parallel>, #tpu.dimension_semantics<parallel>, #tpu.dimension_semantics<parallel>], iteration_bounds = array<i64: 2, 1, 1>, scalar_prefetch = 0 : i64, scratch_operands = 0 : i64, tpu.core_type = #tpu.core_type<tc>, window_params = [{transform_indices = @transform_0, window_bounds = array<i64: 1, 4, 8, 32>}, {pipeline_mode = #tpu.pipeline_mode<synchronous>, transform_indices = @transform_1, window_bounds = array<i64: 16, 16>}, {transform_indices = @transform_2, window_bounds = array<i64: 1, 4, 4, 8, 8>}]} {
    %c0 = arith.constant 0 : index
    %c0_0 = arith.constant 0 : index
    %0 = vector.load %arg4[%c0, %c0_0] : memref<16x16xf32, #tpu.memory_space<vmem>>, vector<16x16xf32>
    %c0_1 = arith.constant 0 : index
    %c0_2 = arith.constant 0 : index
    %c0_3 = arith.constant 0 : index
    %c0_4 = arith.constant 0 : index
    %1 = vector.load %arg3[%c0_1, %c0_2, %c0_3, %c0_4] : memref<1x4x8x32xf32, #tpu.memory_space<vmem>>, vector<1x1x8x32xf32>
    %2 = vector.shape_cast %1 : vector<1x1x8x32xf32> to vector<8x32xf32>
    %3 = vector.extract_strided_slice %2 {offsets = [0, 0], sizes = [8, 16], strides = [1, 1]} : vector<8x32xf32> to vector<8x16xf32>
    %4 = vector.extract_strided_slice %2 {offsets = [0, 16], sizes = [8, 16], strides = [1, 1]} : vector<8x32xf32> to vector<8x16xf32>
    %5 = arith.addf %3, %4 : vector<8x16xf32>
    %6 = arith.subf %4, %3 : vector<8x16xf32>
    %cst = arith.constant dense<0.000000e+00> : vector<8x16xf32>
    %7 = tpu.matmul %5, %0, %cst {dimension_numbers = #tpu.dot_dimension_numbers<[1], [0], [0], [1], [0, 0, 1, 1], [], []>, precision = #tpu.contract_precision<fp32>} : vector<8x16xf32>, vector<16x16xf32>, vector<8x16xf32> -> vector<8x16xf32>
    %cst_5 = arith.constant dense<0.000000e+00> : vector<8x16xf32>
    %8 = tpu.matmul %6, %0, %cst_5 {dimension_numbers = #tpu.dot_dimension_numbers<[1], [0], [0], [1], [0, 0, 1, 1], [], []>, precision = #tpu.contract_precision<fp32>} : vector<8x16xf32>, vector<16x16xf32>, vector<8x16xf32> -> vector<8x16xf32>
    %9 = vector.extract_strided_slice %7 {offsets = [0, 0], sizes = [8, 8], strides = [1, 1]} : vector<8x16xf32> to vector<8x8xf32>
    %c0_6 = arith.constant 0 : index
    %c0_7 = arith.constant 0 : index
    %c0_8 = arith.constant 0 : index
    %c0_9 = arith.constant 0 : index
    %c0_10 = arith.constant 0 : index
    %10 = vector.load %arg5[%c0_6, %c0_7, %c0_8, %c0_9, %c0_10] : memref<1x4x4x8x8xf32, #tpu.memory_space<vmem>>, vector<1x1x1x8x8xf32>
    %11 = vector.shape_cast %10 : vector<1x1x1x8x8xf32> to vector<8x8xf32>
    %12 = vector.shape_cast %9 : vector<8x8xf32> to vector<1x1x1x8x8xf32>
    tpu.vector_store %arg5[%c0_6, %c0_7, %c0_8, %c0_9, %c0_10], %12 {strides = array<i32>} : memref<1x4x4x8x8xf32, #tpu.memory_space<vmem>>, vector<1x1x1x8x8xf32>,
    %13 = vector.extract_strided_slice %8 {offsets = [0, 0], sizes = [8, 8], strides = [1, 1]} : vector<8x16xf32> to vector<8x8xf32>
    %c0_11 = arith.constant 0 : index
    %c1 = arith.constant 1 : index
    %c0_12 = arith.constant 0 : index
    %c0_13 = arith.constant 0 : index
    %c0_14 = arith.constant 0 : index
    %14 = vector.load %arg5[%c0_11, %c1, %c0_12, %c0_13, %c0_14] : memref<1x4x4x8x8xf32, #tpu.memory_space<vmem>>, vector<1x1x1x8x8xf32>
    %15 = vector.shape_cast %14 : vector<1x1x1x8x8xf32> to vector<8x8xf32>
    %16 = vector.shape_cast %13 : vector<8x8xf32> to vector<1x1x1x8x8xf32>
    tpu.vector_store %arg5[%c0_11, %c1, %c0_12, %c0_13, %c0_14], %16 {strides = array<i32>} : memref<1x4x4x8x8xf32, #tpu.memory_space<vmem>>, vector<1x1x1x8x8xf32>,
    %17 = vector.extract_strided_slice %7 {offsets = [0, 8], sizes = [8, 8], strides = [1, 1]} : vector<8x16xf32> to vector<8x8xf32>
    %c0_15 = arith.constant 0 : index
    %c2 = arith.constant 2 : index
    %c0_16 = arith.constant 0 : index
    %c0_17 = arith.constant 0 : index
    %c0_18 = arith.constant 0 : index
    %18 = vector.load %arg5[%c0_15, %c2, %c0_16, %c0_17, %c0_18] : memref<1x4x4x8x8xf32, #tpu.memory_space<vmem>>, vector<1x1x1x8x8xf32>
    %19 = vector.shape_cast %18 : vector<1x1x1x8x8xf32> to vector<8x8xf32>
    %20 = vector.shape_cast %17 : vector<8x8xf32> to vector<1x1x1x8x8xf32>
    tpu.vector_store %arg5[%c0_15, %c2, %c0_16, %c0_17, %c0_18], %20 {strides = array<i32>} : memref<1x4x4x8x8xf32, #tpu.memory_space<vmem>>, vector<1x1x1x8x8xf32>,
    %21 = vector.extract_strided_slice %8 {offsets = [0, 8], sizes = [8, 8], strides = [1, 1]} : vector<8x16xf32> to vector<8x8xf32>
    %c0_19 = arith.constant 0 : index
    %c3 = arith.constant 3 : index
    %c0_20 = arith.constant 0 : index
    %c0_21 = arith.constant 0 : index
    %c0_22 = arith.constant 0 : index
    %22 = vector.load %arg5[%c0_19, %c3, %c0_20, %c0_21, %c0_22] : memref<1x4x4x8x8xf32, #tpu.memory_space<vmem>>, vector<1x1x1x8x8xf32>
    %23 = vector.shape_cast %22 : vector<1x1x1x8x8xf32> to vector<8x8xf32>
    %24 = vector.shape_cast %21 : vector<8x8xf32> to vector<1x1x1x8x8xf32>
    tpu.vector_store %arg5[%c0_19, %c3, %c0_20, %c0_21, %c0_22], %24 {strides = array<i32>} : memref<1x4x4x8x8xf32, #tpu.memory_space<vmem>>, vector<1x1x1x8x8xf32>,
    %c0_23 = arith.constant 0 : index
    %c1_24 = arith.constant 1 : index
    %c0_25 = arith.constant 0 : index
    %c0_26 = arith.constant 0 : index
    %25 = vector.load %arg3[%c0_23, %c1_24, %c0_25, %c0_26] : memref<1x4x8x32xf32, #tpu.memory_space<vmem>>, vector<1x1x8x32xf32>
    %26 = vector.shape_cast %25 : vector<1x1x8x32xf32> to vector<8x32xf32>
    %27 = vector.extract_strided_slice %26 {offsets = [0, 0], sizes = [8, 16], strides = [1, 1]} : vector<8x32xf32> to vector<8x16xf32>
    %28 = vector.extract_strided_slice %26 {offsets = [0, 16], sizes = [8, 16], strides = [1, 1]} : vector<8x32xf32> to vector<8x16xf32>
    %29 = arith.addf %27, %28 : vector<8x16xf32>
    %30 = arith.subf %28, %27 : vector<8x16xf32>
    %cst_27 = arith.constant dense<0.000000e+00> : vector<8x16xf32>
    %31 = tpu.matmul %29, %0, %cst_27 {dimension_numbers = #tpu.dot_dimension_numbers<[1], [0], [0], [1], [0, 0, 1, 1], [], []>, precision = #tpu.contract_precision<fp32>} : vector<8x16xf32>, vector<16x16xf32>, vector<8x16xf32> -> vector<8x16xf32>
    %cst_28 = arith.constant dense<0.000000e+00> : vector<8x16xf32>
    %32 = tpu.matmul %30, %0, %cst_28 {dimension_numbers = #tpu.dot_dimension_numbers<[1], [0], [0], [1], [0, 0, 1, 1], [], []>, precision = #tpu.contract_precision<fp32>} : vector<8x16xf32>, vector<16x16xf32>, vector<8x16xf32> -> vector<8x16xf32>
    %33 = vector.extract_strided_slice %31 {offsets = [0, 0], sizes = [8, 8], strides = [1, 1]} : vector<8x16xf32> to vector<8x8xf32>
    %c0_29 = arith.constant 0 : index
    %c0_30 = arith.constant 0 : index
    %c1_31 = arith.constant 1 : index
    %c0_32 = arith.constant 0 : index
    %c0_33 = arith.constant 0 : index
    %34 = vector.load %arg5[%c0_29, %c0_30, %c1_31, %c0_32, %c0_33] : memref<1x4x4x8x8xf32, #tpu.memory_space<vmem>>, vector<1x1x1x8x8xf32>
    %35 = vector.shape_cast %34 : vector<1x1x1x8x8xf32> to vector<8x8xf32>
    %36 = vector.shape_cast %33 : vector<8x8xf32> to vector<1x1x1x8x8xf32>
    tpu.vector_store %arg5[%c0_29, %c0_30, %c1_31, %c0_32, %c0_33], %36 {strides = array<i32>} : memref<1x4x4x8x8xf32, #tpu.memory_space<vmem>>, vector<1x1x1x8x8xf32>,
    %37 = vector.extract_strided_slice %32 {offsets = [0, 0], sizes = [8, 8], strides = [1, 1]} : vector<8x16xf32> to vector<8x8xf32>
    %c0_34 = arith.constant 0 : index
    %c1_35 = arith.constant 1 : index
    %c1_36 = arith.constant 1 : index
    %c0_37 = arith.constant 0 : index
    %c0_38 = arith.constant 0 : index
    %38 = vector.load %arg5[%c0_34, %c1_35, %c1_36, %c0_37, %c0_38] : memref<1x4x4x8x8xf32, #tpu.memory_space<vmem>>, vector<1x1x1x8x8xf32>
    %39 = vector.shape_cast %38 : vector<1x1x1x8x8xf32> to vector<8x8xf32>
    %40 = vector.shape_cast %37 : vector<8x8xf32> to vector<1x1x1x8x8xf32>
    tpu.vector_store %arg5[%c0_34, %c1_35, %c1_36, %c0_37, %c0_38], %40 {strides = array<i32>} : memref<1x4x4x8x8xf32, #tpu.memory_space<vmem>>, vector<1x1x1x8x8xf32>,
    %41 = vector.extract_strided_slice %31 {offsets = [0, 8], sizes = [8, 8], strides = [1, 1]} : vector<8x16xf32> to vector<8x8xf32>
    %c0_39 = arith.constant 0 : index
    %c2_40 = arith.constant 2 : index
    %c1_41 = arith.constant 1 : index
    %c0_42 = arith.constant 0 : index
    %c0_43 = arith.constant 0 : index
    %42 = vector.load %arg5[%c0_39, %c2_40, %c1_41, %c0_42, %c0_43] : memref<1x4x4x8x8xf32, #tpu.memory_space<vmem>>, vector<1x1x1x8x8xf32>
    %43 = vector.shape_cast %42 : vector<1x1x1x8x8xf32> to vector<8x8xf32>
    %44 = vector.shape_cast %41 : vector<8x8xf32> to vector<1x1x1x8x8xf32>
    tpu.vector_store %arg5[%c0_39, %c2_40, %c1_41, %c0_42, %c0_43], %44 {strides = array<i32>} : memref<1x4x4x8x8xf32, #tpu.memory_space<vmem>>, vector<1x1x1x8x8xf32>,
    %45 = vector.extract_strided_slice %32 {offsets = [0, 8], sizes = [8, 8], strides = [1, 1]} : vector<8x16xf32> to vector<8x8xf32>
    %c0_44 = arith.constant 0 : index
    %c3_45 = arith.constant 3 : index
    %c1_46 = arith.constant 1 : index
    %c0_47 = arith.constant 0 : index
    %c0_48 = arith.constant 0 : index
    %46 = vector.load %arg5[%c0_44, %c3_45, %c1_46, %c0_47, %c0_48] : memref<1x4x4x8x8xf32, #tpu.memory_space<vmem>>, vector<1x1x1x8x8xf32>
    %47 = vector.shape_cast %46 : vector<1x1x1x8x8xf32> to vector<8x8xf32>
    %48 = vector.shape_cast %45 : vector<8x8xf32> to vector<1x1x1x8x8xf32>
    tpu.vector_store %arg5[%c0_44, %c3_45, %c1_46, %c0_47, %c0_48], %48 {strides = array<i32>} : memref<1x4x4x8x8xf32, #tpu.memory_space<vmem>>, vector<1x1x1x8x8xf32>,
    %c0_49 = arith.constant 0 : index
    %c2_50 = arith.constant 2 : index
    %c0_51 = arith.constant 0 : index
    %c0_52 = arith.constant 0 : index
    %49 = vector.load %arg3[%c0_49, %c2_50, %c0_51, %c0_52] : memref<1x4x8x32xf32, #tpu.memory_space<vmem>>, vector<1x1x8x32xf32>
    %50 = vector.shape_cast %49 : vector<1x1x8x32xf32> to vector<8x32xf32>
    %51 = vector.extract_strided_slice %50 {offsets = [0, 0], sizes = [8, 16], strides = [1, 1]} : vector<8x32xf32> to vector<8x16xf32>
    %52 = vector.extract_strided_slice %50 {offsets = [0, 16], sizes = [8, 16], strides = [1, 1]} : vector<8x32xf32> to vector<8x16xf32>
    %53 = arith.addf %51, %52 : vector<8x16xf32>
    %54 = arith.subf %52, %51 : vector<8x16xf32>
    %cst_53 = arith.constant dense<0.000000e+00> : vector<8x16xf32>
    %55 = tpu.matmul %53, %0, %cst_53 {dimension_numbers = #tpu.dot_dimension_numbers<[1], [0], [0], [1], [0, 0, 1, 1], [], []>, precision = #tpu.contract_precision<fp32>} : vector<8x16xf32>, vector<16x16xf32>, vector<8x16xf32> -> vector<8x16xf32>
    %cst_54 = arith.constant dense<0.000000e+00> : vector<8x16xf32>
    %56 = tpu.matmul %54, %0, %cst_54 {dimension_numbers = #tpu.dot_dimension_numbers<[1], [0], [0], [1], [0, 0, 1, 1], [], []>, precision = #tpu.contract_precision<fp32>} : vector<8x16xf32>, vector<16x16xf32>, vector<8x16xf32> -> vector<8x16xf32>
    %57 = vector.extract_strided_slice %55 {offsets = [0, 0], sizes = [8, 8], strides = [1, 1]} : vector<8x16xf32> to vector<8x8xf32>
    %c0_55 = arith.constant 0 : index
    %c0_56 = arith.constant 0 : index
    %c2_57 = arith.constant 2 : index
    %c0_58 = arith.constant 0 : index
    %c0_59 = arith.constant 0 : index
    %58 = vector.load %arg5[%c0_55, %c0_56, %c2_57, %c0_58, %c0_59] : memref<1x4x4x8x8xf32, #tpu.memory_space<vmem>>, vector<1x1x1x8x8xf32>
    %59 = vector.shape_cast %58 : vector<1x1x1x8x8xf32> to vector<8x8xf32>
    %60 = vector.shape_cast %57 : vector<8x8xf32> to vector<1x1x1x8x8xf32>
    tpu.vector_store %arg5[%c0_55, %c0_56, %c2_57, %c0_58, %c0_59], %60 {strides = array<i32>} : memref<1x4x4x8x8xf32, #tpu.memory_space<vmem>>, vector<1x1x1x8x8xf32>,
    %61 = vector.extract_strided_slice %56 {offsets = [0, 0], sizes = [8, 8], strides = [1, 1]} : vector<8x16xf32> to vector<8x8xf32>
    %c0_60 = arith.constant 0 : index
    %c1_61 = arith.constant 1 : index
    %c2_62 = arith.constant 2 : index
    %c0_63 = arith.constant 0 : index
    %c0_64 = arith.constant 0 : index
    %62 = vector.load %arg5[%c0_60, %c1_61, %c2_62, %c0_63, %c0_64] : memref<1x4x4x8x8xf32, #tpu.memory_space<vmem>>, vector<1x1x1x8x8xf32>
    %63 = vector.shape_cast %62 : vector<1x1x1x8x8xf32> to vector<8x8xf32>
    %64 = vector.shape_cast %61 : vector<8x8xf32> to vector<1x1x1x8x8xf32>
    tpu.vector_store %arg5[%c0_60, %c1_61, %c2_62, %c0_63, %c0_64], %64 {strides = array<i32>} : memref<1x4x4x8x8xf32, #tpu.memory_space<vmem>>, vector<1x1x1x8x8xf32>,
    %65 = vector.extract_strided_slice %55 {offsets = [0, 8], sizes = [8, 8], strides = [1, 1]} : vector<8x16xf32> to vector<8x8xf32>
    %c0_65 = arith.constant 0 : index
    %c2_66 = arith.constant 2 : index
    %c2_67 = arith.constant 2 : index
    %c0_68 = arith.constant 0 : index
    %c0_69 = arith.constant 0 : index
    %66 = vector.load %arg5[%c0_65, %c2_66, %c2_67, %c0_68, %c0_69] : memref<1x4x4x8x8xf32, #tpu.memory_space<vmem>>, vector<1x1x1x8x8xf32>
    %67 = vector.shape_cast %66 : vector<1x1x1x8x8xf32> to vector<8x8xf32>
    %68 = vector.shape_cast %65 : vector<8x8xf32> to vector<1x1x1x8x8xf32>
    tpu.vector_store %arg5[%c0_65, %c2_66, %c2_67, %c0_68, %c0_69], %68 {strides = array<i32>} : memref<1x4x4x8x8xf32, #tpu.memory_space<vmem>>, vector<1x1x1x8x8xf32>,
    %69 = vector.extract_strided_slice %56 {offsets = [0, 8], sizes = [8, 8], strides = [1, 1]} : vector<8x16xf32> to vector<8x8xf32>
    %c0_70 = arith.constant 0 : index
    %c3_71 = arith.constant 3 : index
    %c2_72 = arith.constant 2 : index
    %c0_73 = arith.constant 0 : index
    %c0_74 = arith.constant 0 : index
    %70 = vector.load %arg5[%c0_70, %c3_71, %c2_72, %c0_73, %c0_74] : memref<1x4x4x8x8xf32, #tpu.memory_space<vmem>>, vector<1x1x1x8x8xf32>
    %71 = vector.shape_cast %70 : vector<1x1x1x8x8xf32> to vector<8x8xf32>
    %72 = vector.shape_cast %69 : vector<8x8xf32> to vector<1x1x1x8x8xf32>
    tpu.vector_store %arg5[%c0_70, %c3_71, %c2_72, %c0_73, %c0_74], %72 {strides = array<i32>} : memref<1x4x4x8x8xf32, #tpu.memory_space<vmem>>, vector<1x1x1x8x8xf32>,
    %c0_75 = arith.constant 0 : index
    %c3_76 = arith.constant 3 : index
    %c0_77 = arith.constant 0 : index
    %c0_78 = arith.constant 0 : index
    %73 = vector.load %arg3[%c0_75, %c3_76, %c0_77, %c0_78] : memref<1x4x8x32xf32, #tpu.memory_space<vmem>>, vector<1x1x8x32xf32>
    %74 = vector.shape_cast %73 : vector<1x1x8x32xf32> to vector<8x32xf32>
    %75 = vector.extract_strided_slice %74 {offsets = [0, 0], sizes = [8, 16], strides = [1, 1]} : vector<8x32xf32> to vector<8x16xf32>
    %76 = vector.extract_strided_slice %74 {offsets = [0, 16], sizes = [8, 16], strides = [1, 1]} : vector<8x32xf32> to vector<8x16xf32>
    %77 = arith.addf %75, %76 : vector<8x16xf32>
    %78 = arith.subf %76, %75 : vector<8x16xf32>
    %cst_79 = arith.constant dense<0.000000e+00> : vector<8x16xf32>
    %79 = tpu.matmul %77, %0, %cst_79 {dimension_numbers = #tpu.dot_dimension_numbers<[1], [0], [0], [1], [0, 0, 1, 1], [], []>, precision = #tpu.contract_precision<fp32>} : vector<8x16xf32>, vector<16x16xf32>, vector<8x16xf32> -> vector<8x16xf32>
    %cst_80 = arith.constant dense<0.000000e+00> : vector<8x16xf32>
    %80 = tpu.matmul %78, %0, %cst_80 {dimension_numbers = #tpu.dot_dimension_numbers<[1], [0], [0], [1], [0, 0, 1, 1], [], []>, precision = #tpu.contract_precision<fp32>} : vector<8x16xf32>, vector<16x16xf32>, vector<8x16xf32> -> vector<8x16xf32>
    %81 = vector.extract_strided_slice %79 {offsets = [0, 0], sizes = [8, 8], strides = [1, 1]} : vector<8x16xf32> to vector<8x8xf32>
    %c0_81 = arith.constant 0 : index
    %c0_82 = arith.constant 0 : index
    %c3_83 = arith.constant 3 : index
    %c0_84 = arith.constant 0 : index
    %c0_85 = arith.constant 0 : index
    %82 = vector.load %arg5[%c0_81, %c0_82, %c3_83, %c0_84, %c0_85] : memref<1x4x4x8x8xf32, #tpu.memory_space<vmem>>, vector<1x1x1x8x8xf32>
    %83 = vector.shape_cast %82 : vector<1x1x1x8x8xf32> to vector<8x8xf32>
    %84 = vector.shape_cast %81 : vector<8x8xf32> to vector<1x1x1x8x8xf32>
    tpu.vector_store %arg5[%c0_81, %c0_82, %c3_83, %c0_84, %c0_85], %84 {strides = array<i32>} : memref<1x4x4x8x8xf32, #tpu.memory_space<vmem>>, vector<1x1x1x8x8xf32>,
    %85 = vector.extract_strided_slice %80 {offsets = [0, 0], sizes = [8, 8], strides = [1, 1]} : vector<8x16xf32> to vector<8x8xf32>
    %c0_86 = arith.constant 0 : index
    %c1_87 = arith.constant 1 : index
    %c3_88 = arith.constant 3 : index
    %c0_89 = arith.constant 0 : index
    %c0_90 = arith.constant 0 : index
    %86 = vector.load %arg5[%c0_86, %c1_87, %c3_88, %c0_89, %c0_90] : memref<1x4x4x8x8xf32, #tpu.memory_space<vmem>>, vector<1x1x1x8x8xf32>
    %87 = vector.shape_cast %86 : vector<1x1x1x8x8xf32> to vector<8x8xf32>
    %88 = vector.shape_cast %85 : vector<8x8xf32> to vector<1x1x1x8x8xf32>
    tpu.vector_store %arg5[%c0_86, %c1_87, %c3_88, %c0_89, %c0_90], %88 {strides = array<i32>} : memref<1x4x4x8x8xf32, #tpu.memory_space<vmem>>, vector<1x1x1x8x8xf32>,
    %89 = vector.extract_strided_slice %79 {offsets = [0, 8], sizes = [8, 8], strides = [1, 1]} : vector<8x16xf32> to vector<8x8xf32>
    %c0_91 = arith.constant 0 : index
    %c2_92 = arith.constant 2 : index
    %c3_93 = arith.constant 3 : index
    %c0_94 = arith.constant 0 : index
    %c0_95 = arith.constant 0 : index
    %90 = vector.load %arg5[%c0_91, %c2_92, %c3_93, %c0_94, %c0_95] : memref<1x4x4x8x8xf32, #tpu.memory_space<vmem>>, vector<1x1x1x8x8xf32>
    %91 = vector.shape_cast %90 : vector<1x1x1x8x8xf32> to vector<8x8xf32>
    %92 = vector.shape_cast %89 : vector<8x8xf32> to vector<1x1x1x8x8xf32>
    tpu.vector_store %arg5[%c0_91, %c2_92, %c3_93, %c0_94, %c0_95], %92 {strides = array<i32>} : memref<1x4x4x8x8xf32, #tpu.memory_space<vmem>>, vector<1x1x1x8x8xf32>,
    %93 = vector.extract_strided_slice %80 {offsets = [0, 8], sizes = [8, 8], strides = [1, 1]} : vector<8x16xf32> to vector<8x8xf32>
    %c0_96 = arith.constant 0 : index
    %c3_97 = arith.constant 3 : index
    %c3_98 = arith.constant 3 : index
    %c0_99 = arith.constant 0 : index
    %c0_100 = arith.constant 0 : index
    %94 = vector.load %arg5[%c0_96, %c3_97, %c3_98, %c0_99, %c0_100] : memref<1x4x4x8x8xf32, #tpu.memory_space<vmem>>, vector<1x1x1x8x8xf32>
    %95 = vector.shape_cast %94 : vector<1x1x1x8x8xf32> to vector<8x8xf32>
    %96 = vector.shape_cast %93 : vector<8x8xf32> to vector<1x1x1x8x8xf32>
    tpu.vector_store %arg5[%c0_96, %c3_97, %c3_98, %c0_99, %c0_100], %96 {strides = array<i32>} : memref<1x4x4x8x8xf32, #tpu.memory_space<vmem>>, vector<1x1x1x8x8xf32>,
    return
  }
  func.func @transform_0(%arg0: i32, %arg1: i32, %arg2: i32) -> (i32, i32, i32, i32) {
    %c0_i32 = arith.constant 0 : i32
    %c0_i32_0 = arith.constant 0 : i32
    return %arg0, %arg1, %arg2, %c0_i32 : i32, i32, i32, i32
  }
  func.func @transform_1(%arg0: i32, %arg1: i32, %arg2: i32) -> (i32, i32) {
    %c0_i32 = arith.constant 0 : i32
    %c0_i32_0 = arith.constant 0 : i32
    %c0_i32_1 = arith.constant 0 : i32
    return %c0_i32, %c0_i32_0 : i32, i32
  }
  func.func @transform_2(%arg0: i32, %arg1: i32, %arg2: i32) -> (i32, i32, i32, i32, i32) {
    %c0_i32 = arith.constant 0 : i32
    %c0_i32_0 = arith.constant 0 : i32
    %c0_i32_1 = arith.constant 0 : i32
    return %arg0, %c0_i32, %arg1, %arg2, %c0_i32_0 : i32, i32, i32, i32, i32
  }
}

</mosaic_0001>

<bundles_post_ra>
// kernel: dwt_forward.1
= control target key start
LH: loop header
LB: loop body
LE: loop exit
PB: predicated region body
PF: predicated region fallthrough
CT: control target
= control target key end

     0   :  { %s4710_s9 = smov 0   ;;  %s4712_s10 = smov 0   ;;  %s5186_s0 = inlined_call_operand.vmem [shape: f32[2,4,8,32], index: 0, kind: input, shape index: {}]   ;;  %s5187_s1 = inlined_call_operand.vmem [shape: f32[16,16], index: 1, kind: input, shape index: {}]   ;;  %s5188_s2 = inlined_call_operand.vmem [shape: f32[2,4,4,8,8], index: 2, kind: output, shape index: {}]  }
   0x1   :  { %s4714_s11 = smov 0  }
   0x2 LB: > { %s31_s12 = sadd.s32 1, %s4684_s10  ;;  %p4130_p0 = scmp.ge.s32.totalorder %s4688_s11, 1  ;;  %s4688_s11 = sphi %s4714_s11, %s12_s11   ;;  %s4684_s10 = sphi %s4712_s10, %s5190_s10   ;;  %s4680_s9 = sphi %s4710_s9, %s5189_s9  }
   0x3   : > { %p33_p1 = scmp.ge.s32.totalorder %s31_s12, 2  ;;  %p147_p2 = scmp.lt.s32.totalorder %s4688_s11, 3 }
   0x5   : > { %s5192_s12 = smov (%p33_p1, %s31_s12), 0  ;;  %p148_p3 = pnand %p4130_p0, %p147_p2 }
   0x6   : > { %p184_p4 = scmp.lt.s32.totalorder (!%p148_p3), %s4680_s9, 1  ;;  %s4692_s21 = smov (!%p148_p3), 16  }
   0x7   : > { %151 = sbr.rel (%p148_p3) target bundleno = 701 (0x2bd), region = 28  ;;  %s4693_s22 = smov (!%p148_p3), 112  }
   0x8   : > { %s4694_s27 = smov (!%p148_p3), 120  }
   0xc   : > { %s5194_s9 = smov (!%p184_p4, %s4680_s9), 1  ;;  %v210_v0 = vld [vmem:[%s5187_s1 + $0x8] sm:$0xff]  ;;  %v209_v1 = vld [vmem:[%s5187_s1] sm:$0xff]  ;;  %v4690_v2 = vmov 0.0   ;;  %vm4691_vm0 = vmmov 0   ;;  %vm221_vm1 = vcmask 130048  }
   0xd   : > { %s4155_s13 = sshll.u32 %s5194_s9, 5  ;;  %4301 = vmatprep.subr.mxu0 %v4690_v2  ;;  %4308 = vmatprep.subr.mxu1 %v4690_v2  ;;  %v4744_v3 = vand.u32 4294901760, %v210_v0  ;;  %v4746_v4 = vand.u32 4294901760, %v209_v1  ;;  %s4156_s23 = sshll.u32 %s5194_s9, 7  ;;  %vm1148_vm2 = vcmask 64512  }
   0xe   : > { %s4740_s20 = scalar_lea.vmem %s5186_s0, %s4155_s13  ;;  %4305 = vmatprep.mubr.msk.f32.mxu0 %vm4691_vm0, %v4690_v2  ;;  %4312 = vmatprep.mubr.msk.f32.mxu1 %vm4691_vm0, %v4690_v2  ;;  %s5076_s26 = scalar_lea.vmem %s5188_s2, %s4156_s23 }
   0xf   : > { %v211_v5 = vld [vmem:[%s4740_s20] sm:$0xff]  ;;  %v4756_v6 = vsub.f32 %v210_v0, %v4744_v3  ;;  %v4759_v7 = vsub.f32 %v209_v1, %v4746_v4  ;;  %v4762_v8 = vld [vmem:[%s4740_s20 + $0x8] sm:$0xff]  ;;  %v4765_v9 = vld [vmem:[%s4740_s20 + $0x10] sm:$0xff]  ;;  %4302 = vmatpush3.msra.mxu0 %v4744_v3 }
  0x10   : > { %217 = vrot.lane.b32.xlu0 %v211_v5, %s4692_s21  ;;  %213 = vrot.lane.b32.xlu1 %v211_v5, %s4693_s22  ;;  %v4798_v21 = vld [vmem:[%s4740_s20 + $0x18] sm:$0xff] }
  0x11   : > { %v4769_v10 = vand.u32 4294901760, %v4756_v6  ;;  %4303 = vmatprep.subr.mxu0 %v4690_v2  ;;  %v4773_v11 = vand.u32 4294901760, %v4759_v7 }
  0x12   : > { %4304 = vmatpush3.msra.mxu0 %v4746_v4 }
  0x13   : > { %v334_v12 = vsub.f32 %v4756_v6, %v4769_v10  ;;  %v341_v13 = vsub.f32 %v4759_v7, %v4773_v11  ;;  %4315 = vmatprep.subr.mxu0 %v4690_v2 }
  0x14   : > { %1171 = vrot.lane.b32.xlu0 %v4762_v8, %s4692_s21  ;;  %2124 = vrot.lane.b32.xlu1 %v4765_v9, %s4692_s21 }
  0x15   : > { %v4785_v14 = vand.u32 4294901760, %v334_v12  ;;  %v4787_v15 = vand.u32 4294901760, %v341_v13 }
  0x17   : > { %4309 = vmatpush3.msra.mxu1 %v4785_v14 }
  0x18   : > { %1167 = vrot.lane.b32.xlu1 %v4762_v8, %s4693_s22  ;;  %4310 = vmatprep.subr.mxu1 %v4690_v2 }
  0x19   : > { %4311 = vmatpush3.msra.mxu1 %v4787_v15 }
  0x1a   : > { %4322 = vmatprep.subr.mxu1 %v4690_v2 }
  0x82   : > { %v218_v16 = vpop.permute.xlu0 %217  ;;  %v214_v17 = vpop.permute.xlu1 %213 }
  0x83   : > { %v220_v18 = vsub.f32 %v211_v5, %v218_v16  ;;  %v216_v19 = vadd.f32 %v214_v17, %v211_v5 }
  0x85   : > { %685 = vrot.lane.b32.xlu0 %v220_v18, %s4693_s22  ;;  %v223_v20 = vsel %vm221_vm1, %v216_v19, 0 }
  0x86   : > { %v1172_v22 = vpop.permute.xlu0 %1171  ;;  %v292_v23 = vand.u32 4294901760, %v223_v20  ;;  %v2125_v24 = vpop.permute.xlu1 %2124 }
  0x87   : > { %v1174_v25 = vsub.f32 %v4762_v8, %v1172_v22  ;;  %v2127_v27 = vsub.f32 %v4765_v9, %v2125_v24 }
  0x88   : > { %v293_v26 = vsub.f32 %v223_v20, %v292_v23  ;;  %4313 = vmatmul.mubr.f32.vlgmr.msra.gmra.mxu1 %v292_v23 }
  0x89   : > { %3077 = vrot.lane.b32.xlu0 %v4798_v21, %s4692_s21  ;;  %1638 = vrot.lane.b32.xlu1 %v1174_v25, %s4693_s22 }
  0x8a   : > { %v294_v28 = vand.u32 4294901760, %v293_v26  ;;  %4323 = vmatpush3.msra.mxu1 %v4744_v3  ;;  %4326 = vmatprep.mubr.msk.f32.mxu1 %vm4691_vm0, %v4690_v2  ;;  %v1168_v31 = vpop.permute.xlu1 %1167 }
  0x8b   : > { %4324 = vmatprep.subr.mxu1 %v4690_v2  ;;  %v1170_v32 = vadd.f32 %v4762_v8, %v1168_v31 }
  0x8c   : > { %v295_v29 = vsub.f32 %v293_v26, %v294_v28  ;;  %4325 = vmatpush3.msra.mxu1 %v4746_v4 }
  0x8d   : > { %2120 = vrot.lane.b32.xlu0 %v4765_v9, %s4693_s22  ;;  %2591 = vrot.lane.b32.xlu1 %v2127_v27, %s4693_s22  ;;  %v1176_v35 = vsel %vm221_vm1, %v1170_v32, 0 }
  0x8e   : > { %v296_v30 = vand.u32 4294901760, %v295_v29  ;;  %4327 = vmatmul.mubr.f32.vlgmr.msra.gmra.mxu1 %v294_v28  ;;  %4336 = vmatprep.subr.mxu1 %v4690_v2  ;;  %v4849_v39 = vand.u32 4294901760, %v1176_v35 }
  0x8f   : > { %4337 = vmatpush3.msra.mxu1 %v4744_v3  ;;  %4340 = vmatprep.mubr.msk.f32.mxu1 %vm4691_vm0, %v4690_v2 }
  0x90   : > { %4306 = vmatmul.mubr.f32.vlgmr.msra.gmra.mxu0 %v296_v30  ;;  %4338 = vmatprep.subr.mxu1 %v4690_v2  ;;  %v1246_v43 = vsub.f32 %v1176_v35, %v4849_v39 }
  0x91   : > { %4316 = vmatpush3.msra.mxu0 %v4756_v6  ;;  %4319 = vmatprep.mubr.msk.f32.mxu0 %vm4691_vm0, %v4690_v2 }
  0x92   : > { %4317 = vmatprep.subr.mxu0 %v4690_v2  ;;  %3073 = vrot.lane.b32.xlu0 %v4798_v21, %s4693_s22  ;;  %v1247_v45 = vand.u32 4294901760, %v1246_v43 }
  0x93   : > { %4318 = vmatpush3.msra.mxu0 %v4759_v7  ;;  %4339 = vmatpush3.msra.mxu1 %v4746_v4 }
  0x94   : > { %4320 = vmatmul.mubr.f32.vlgmr.msra.gmra.mxu0 %v293_v26  ;;  %4329 = vmatprep.subr.mxu0 %v4690_v2  ;;  %v1248_v47 = vsub.f32 %v1246_v43, %v1247_v45 }
  0x95   : > { %4330 = vmatpush3.msra.mxu0 %v4769_v10  ;;  %4333 = vmatprep.mubr.msk.f32.mxu0 %vm4691_vm0, %v4690_v2 }
  0x96   : > { %4331 = vmatprep.subr.mxu0 %v4690_v2  ;;  %4341 = vmatmul.mubr.f32.vlgmr.msra.gmra.mxu1 %v292_v23  ;;  %v1249_v49 = vand.u32 4294901760, %v1248_v47 }
  0x97   : > { %4332 = vmatpush3.msra.mxu0 %v4773_v11  ;;  %4350 = vmatprep.subr.mxu1 %v4690_v2 }
  0x98   : > { %4334 = vmatmul.mubr.f32.vlgmr.msra.gmra.mxu0 %v292_v23  ;;  %4351 = vmatpush3.msra.mxu1 %v4785_v14 }
  0x99   : > { %4352 = vmatprep.subr.mxu1 %v4690_v2  ;;  %4354 = vmatprep.mubr.msk.f32.mxu1 %vm4691_vm0, %v4690_v2 }
  0x9a   : > { %4353 = vmatpush3.msra.mxu1 %v4787_v15  ;;  %4343 = vmatprep.subr.mxu0 %v4690_v2 }
  0x9b   : > { %4364 = vmatprep.subr.mxu1 %v4690_v2  ;;  %4344 = vmatpush3.msra.mxu0 %v4744_v3 }
  0x9c   : > { %4345 = vmatprep.subr.mxu0 %v4690_v2  ;;  %4347 = vmatprep.mubr.msk.f32.mxu0 %vm4691_vm0, %v4690_v2 }
  0x9d   : > { %4346 = vmatpush3.msra.mxu0 %v4746_v4 }
  0x9e   : > { %4357 = vmatprep.subr.mxu0 %v4690_v2 }
  0xf7   : > { %v686_v33 = vpop.permute.xlu0 %685 }
  0xf8   : > { %v687_v34 = vsel %vm221_vm1, %v686_v33, 0 }
  0xf9   : > { %v756_v36 = vand.u32 4294901760, %v687_v34 }
  0xfb   : > { %v757_v37 = vsub.f32 %v687_v34, %v756_v36  ;;  %4355 = vmatmul.mubr.f32.vlgmr.msra.gmra.mxu1 %v756_v36  ;;  %v3078_v38 = vpop.permute.xlu0 %3077  ;;  %v1639_v46 = vpop.permute.xlu1 %1638 }
  0xfc   : > { %v3080_v40 = vsub.f32 %v4798_v21, %v3078_v38  ;;  %4365 = vmatpush3.msra.mxu1 %v4744_v3  ;;  %4368 = vmatprep.mubr.msk.f32.mxu1 %vm4691_vm0, %v4690_v2  ;;  %v1640_v48 = vsel %vm221_vm1, %v1639_v46, 0 }
  0xfd   : > { %v758_v41 = vand.u32 4294901760, %v757_v37  ;;  %4366 = vmatprep.subr.mxu1 %v4690_v2  ;;  %v4885_v50 = vand.u32 4294901760, %v1640_v48 }
  0xfe   : > { %4367 = vmatpush3.msra.mxu1 %v4746_v4  ;;  %3544 = vrot.lane.b32.xlu1 %v3080_v40, %s4693_s22 }
  0xff   : > { %v759_v42 = vsub.f32 %v757_v37, %v758_v41  ;;  %4369 = vmatmul.mubr.f32.vlgmr.msra.gmra.mxu1 %v758_v41  ;;  %4378 = vmatprep.subr.mxu1 %v4690_v2  ;;  %v1710_v51 = vsub.f32 %v1640_v48, %v4885_v50  ;;  %v2121_v53 = vpop.permute.xlu0 %2120  ;;  %v2592_v61 = vpop.permute.xlu1 %2591 }
 0x100   : > { %4379 = vmatpush3.msra.mxu1 %v4744_v3  ;;  %4382 = vmatprep.mubr.msk.f32.mxu1 %vm4691_vm0, %v4690_v2  ;;  %v2123_v54 = vadd.f32 %v4765_v9, %v2121_v53  ;;  %v2593_v63 = vsel %vm221_vm1, %v2592_v61, 0 }
 0x101   : > { %v760_v44 = vand.u32 4294901760, %v759_v42  ;;  %4380 = vmatprep.subr.mxu1 %v4690_v2  ;;  %v1711_v52 = vand.u32 4294901760, %v1710_v51  ;;  %v4971_v1 = vand.u32 4294901760, %v2593_v63 }
 0x102   : > { %4381 = vmatpush3.msra.mxu1 %v4746_v4  ;;  %v2129_v56 = vsel %vm221_vm1, %v2123_v54, 0 }
 0x103   : > { %4348 = vmatmul.mubr.f32.vlgmr.msra.gmra.mxu0 %v760_v44  ;;  %4383 = vmatmul.mubr.f32.vlgmr.msra.gmra.mxu1 %v756_v36  ;;  %v1712_v55 = vsub.f32 %v1710_v51, %v1711_v52  ;;  %v4927_v58 = vand.u32 4294901760, %v2129_v56  ;;  %v2663_v5 = vsub.f32 %v2593_v63, %v4971_v1 }
 0x104   : > { %4358 = vmatpush3.msra.mxu0 %v4756_v6  ;;  %4361 = vmatprep.mubr.msk.f32.mxu0 %vm4691_vm0, %v4690_v2  ;;  %v3074_v9 = vpop.permute.xlu0 %3073 }
 0x105   : > { %4359 = vmatprep.subr.mxu0 %v4690_v2  ;;  %4392 = vmatprep.subr.mxu1 %v4690_v2  ;;  %v1713_v57 = vand.u32 4294901760, %v1712_v55  ;;  %v2199_v59 = vsub.f32 %v2129_v56, %v4927_v58  ;;  %v2664_v8 = vand.u32 4294901760, %v2663_v5  ;;  %v3076_v12 = vadd.f32 %v4798_v21, %v3074_v9 }
 0x106   : > { %4360 = vmatpush3.msra.mxu0 %v4759_v7  ;;  %4393 = vmatpush3.msra.mxu1 %v4785_v14 }
 0x107   : > { %4362 = vmatmul.mubr.f32.vlgmr.msra.gmra.mxu0 %v757_v37  ;;  %4371 = vmatprep.subr.mxu0 %v4690_v2  ;;  %v2200_v60 = vand.u32 4294901760, %v2199_v59  ;;  %v2665_v13 = vsub.f32 %v2663_v5, %v2664_v8  ;;  %v3082_v16 = vsel %vm221_vm1, %v3076_v12, 0 }
 0x108   : > { %4372 = vmatpush3.msra.mxu0 %v4769_v10  ;;  %4375 = vmatprep.mubr.msk.f32.mxu0 %vm4691_vm0, %v4690_v2  ;;  %v5014_v18 = vand.u32 4294901760, %v3082_v16 }
 0x109   : > { %4373 = vmatprep.subr.mxu0 %v4690_v2  ;;  %4394 = vmatprep.subr.mxu1 %v4690_v2  ;;  %v2201_v62 = vsub.f32 %v2199_v59, %v2200_v60  ;;  %v2666_v17 = vand.u32 4294901760, %v2665_v13 }
 0x10a   : > { %4374 = vmatpush3.msra.mxu0 %v4773_v11  ;;  %4395 = vmatpush3.msra.mxu1 %v4787_v15  ;;  %v5025_v19 = vsub.f32 %v3082_v16, %v5014_v18 }
 0x10b   : > { %4376 = vmatmul.mubr.f32.vlgmr.msra.gmra.mxu0 %v756_v36  ;;  %4385 = vmatprep.subr.mxu0 %v4690_v2  ;;  %v2202_v0 = vand.u32 4294901760, %v2201_v62 }
 0x10c   : > { %4386 = vmatpush3.msra.mxu0 %v4744_v3  ;;  %4389 = vmatprep.mubr.msk.f32.mxu0 %vm4691_vm0, %v4690_v2  ;;  %v3153_v21 = vand.u32 4294901760, %v5025_v19 }
 0x10d   : > { %4387 = vmatprep.subr.mxu0 %v4690_v2  ;;  %4396 = vmatprep.mubr.msk.f32.mxu1 %vm4691_vm0, %v4690_v2 }
 0x10e   : > { %4388 = vmatpush3.msra.mxu0 %v4746_v4  ;;  %4397 = vmatmul.mubr.f32.vlgmr.msra.gmra.mxu1 %v4849_v39  ;;  %v3154_v23 = vsub.f32 %v5025_v19, %v3153_v21 }
 0x10f   : > { %4390 = vmatmul.mubr.f32.vlgmr.msra.gmra.mxu0 %v1249_v49  ;;  %4399 = vmatprep.subr.mxu0 %v4690_v2 }
 0x110   : > { %4406 = vmatprep.subr.mxu1 %v4690_v2  ;;  %4400 = vmatpush3.msra.mxu0 %v4756_v6  ;;  %v3155_v28 = vand.u32 4294901760, %v3154_v23 }
 0x111   : > { %4407 = vmatpush3.msra.mxu1 %v4744_v3  ;;  %4401 = vmatprep.subr.mxu0 %v4690_v2 }
 0x112   : > { %4408 = vmatprep.subr.mxu1 %v4690_v2  ;;  %4402 = vmatpush3.msra.mxu0 %v4759_v7 }
 0x113   : > { %4403 = vmatprep.mubr.msk.f32.mxu0 %vm4691_vm0, %v4690_v2  ;;  %4409 = vmatpush3.msra.mxu1 %v4746_v4 }
 0x114   : > { %4410 = vmatprep.mubr.msk.f32.mxu1 %vm4691_vm0, %v4690_v2  ;;  %4404 = vmatmul.mubr.f32.vlgmr.msra.gmra.mxu0 %v1246_v43 }
 0x115   : > { %4411 = vmatmul.mubr.f32.vlgmr.msra.gmra.mxu1 %v1247_v45  ;;  %4413 = vmatprep.subr.mxu0 %v4690_v2 }
 0x116   : > { %4420 = vmatprep.subr.mxu1 %v4690_v2  ;;  %4414 = vmatpush3.msra.mxu0 %v4769_v10 }
 0x117   : > { %4421 = vmatpush3.msra.mxu1 %v4744_v3  ;;  %4415 = vmatprep.subr.mxu0 %v4690_v2 }
 0x118   : > { %4422 = vmatprep.subr.mxu1 %v4690_v2  ;;  %4416 = vmatpush3.msra.mxu0 %v4773_v11 }
 0x119   : > { %4417 = vmatprep.mubr.msk.f32.mxu0 %vm4691_vm0, %v4690_v2  ;;  %4423 = vmatpush3.msra.mxu1 %v4746_v4 }
 0x11a   : > { %4424 = vmatprep.mubr.msk.f32.mxu1 %vm4691_vm0, %v4690_v2  ;;  %4418 = vmatmul.mubr.f32.vlgmr.msra.gmra.mxu0 %v4849_v39 }
 0x11b   : > { %4425 = vmatmul.mubr.f32.vlgmr.msra.gmra.mxu1 %v4849_v39  ;;  %4427 = vmatprep.subr.mxu0 %v4690_v2 }
 0x11c   : > { %4434 = vmatprep.subr.mxu1 %v4690_v2  ;;  %4428 = vmatpush3.msra.mxu0 %v4744_v3 }
 0x11d   : > { %4435 = vmatpush3.msra.mxu1 %v4785_v14  ;;  %4429 = vmatprep.subr.mxu0 %v4690_v2 }
 0x11e   : > { %4436 = vmatprep.subr.mxu1 %v4690_v2  ;;  %4430 = vmatpush3.msra.mxu0 %v4746_v4 }
 0x11f   : > { %4431 = vmatprep.mubr.msk.f32.mxu0 %vm4691_vm0, %v4690_v2  ;;  %4437 = vmatpush3.msra.mxu1 %v4787_v15 }
 0x120   : > { %4438 = vmatprep.mubr.msk.f32.mxu1 %vm4691_vm0, %v4690_v2  ;;  %4432 = vmatmul.mubr.f32.vlgmr.msra.gmra.mxu0 %v1713_v57 }
 0x121   : > { %4439 = vmatmul.mubr.f32.vlgmr.msra.gmra.mxu1 %v4885_v50  ;;  %4441 = vmatprep.subr.mxu0 %v4690_v2 }
 0x122   : > { %4448 = vmatprep.subr.mxu1 %v4690_v2  ;;  %4442 = vmatpush3.msra.mxu0 %v4756_v6 }
 0x123   : > { %4449 = vmatpush3.msra.mxu1 %v4744_v3  ;;  %4443 = vmatprep.subr.mxu0 %v4690_v2 }
 0x124   : > { %4450 = vmatprep.subr.mxu1 %v4690_v2  ;;  %4444 = vmatpush3.msra.mxu0 %v4759_v7 }
 0x125   : > { %4445 = vmatprep.mubr.msk.f32.mxu0 %vm4691_vm0, %v4690_v2  ;;  %4451 = vmatpush3.msra.mxu1 %v4746_v4 }
 0x126   : > { %4452 = vmatprep.mubr.msk.f32.mxu1 %vm4691_vm0, %v4690_v2  ;;  %4446 = vmatmul.mubr.f32.vlgmr.msra.gmra.mxu0 %v1710_v51 }
 0x127   : > { %4453 = vmatmul.mubr.f32.vlgmr.msra.gmra.mxu1 %v1711_v52  ;;  %4455 = vmatprep.subr.mxu0 %v4690_v2 }
 0x128   : > { %4462 = vmatprep.subr.mxu1 %v4690_v2  ;;  %4456 = vmatpush3.msra.mxu0 %v4769_v10 }
 0x129   : > { %4463 = vmatpush3.msra.mxu1 %v4744_v3  ;;  %4457 = vmatprep.subr.mxu0 %v4690_v2 }
 0x12a   : > { %4464 = vmatprep.subr.mxu1 %v4690_v2  ;;  %4458 = vmatpush3.msra.mxu0 %v4773_v11 }
 0x12b   : > { %4459 = vmatprep.mubr.msk.f32.mxu0 %vm4691_vm0, %v4690_v2  ;;  %4465 = vmatpush3.msra.mxu1 %v4746_v4 }
 0x12c   : > { %4466 = vmatprep.mubr.msk.f32.mxu1 %vm4691_vm0, %v4690_v2  ;;  %4460 = vmatmul.mubr.f32.vlgmr.msra.gmra.mxu0 %v4885_v50 }
 0x12d   : > { %4467 = vmatmul.mubr.f32.vlgmr.msra.gmra.mxu1 %v4885_v50  ;;  %4469 = vmatprep.subr.mxu0 %v4690_v2 }
 0x12e   : > { %4476 = vmatprep.subr.mxu1 %v4690_v2  ;;  %4470 = vmatpush3.msra.mxu0 %v4744_v3 }
 0x12f   : > { %4477 = vmatpush3.msra.mxu1 %v4785_v14  ;;  %4471 = vmatprep.subr.mxu0 %v4690_v2 }
 0x130   : > { %4478 = vmatprep.subr.mxu1 %v4690_v2  ;;  %4472 = vmatpush3.msra.mxu0 %v4746_v4 }
 0x131   : > { %4473 = vmatprep.mubr.msk.f32.mxu0 %vm4691_vm0, %v4690_v2  ;;  %4479 = vmatpush3.msra.mxu1 %v4787_v15 }
 0x132   : > { %4480 = vmatprep.mubr.msk.f32.mxu1 %vm4691_vm0, %v4690_v2  ;;  %4474 = vmatmul.mubr.f32.vlgmr.msra.gmra.mxu0 %v2202_v0 }
 0x133   : > { %4481 = vmatmul.mubr.f32.vlgmr.msra.gmra.mxu1 %v4927_v58  ;;  %4483 = vmatprep.subr.mxu0 %v4690_v2 }
 0x134   : > { %4490 = vmatprep.subr.mxu1 %v4690_v2  ;;  %4484 = vmatpush3.msra.mxu0 %v4756_v6 }
 0x135   : > { %4491 = vmatpush3.msra.mxu1 %v4744_v3  ;;  %4485 = vmatprep.subr.mxu0 %v4690_v2 }
 0x136   : > { %4492 = vmatprep.subr.mxu1 %v4690_v2  ;;  %4486 = vmatpush3.msra.mxu0 %v4759_v7 }
 0x137   : > { %4487 = vmatprep.mubr.msk.f32.mxu0 %vm4691_vm0, %v4690_v2  ;;  %4493 = vmatpush3.msra.mxu1 %v4746_v4 }
 0x138   : > { %4494 = vmatprep.mubr.msk.f32.mxu1 %vm4691_vm0, %v4690_v2  ;;  %4488 = vmatmul.mubr.f32.vlgmr.msra.gmra.mxu0 %v2199_v59 }
 0x139   : > { %4495 = vmatmul.mubr.f32.vlgmr.msra.gmra.mxu1 %v2200_v60  ;;  %4497 = vmatprep.subr.mxu0 %v4690_v2 }
 0x13a   : > { %4504 = vmatprep.subr.mxu1 %v4690_v2  ;;  %4498 = vmatpush3.msra.mxu0 %v4769_v10 }
 0x13b   : > { %4505 = vmatpush3.msra.mxu1 %v4744_v3  ;;  %4499 = vmatprep.subr.mxu0 %v4690_v2 }
 0x13c   : > { %4506 = vmatprep.subr.mxu1 %v4690_v2  ;;  %4500 = vmatpush3.msra.mxu0 %v4773_v11 }
 0x13d   : > { %4501 = vmatprep.mubr.msk.f32.mxu0 %vm4691_vm0, %v4690_v2  ;;  %4507 = vmatpush3.msra.mxu1 %v4746_v4 }
 0x13e   : > { %4508 = vmatprep.mubr.msk.f32.mxu1 %vm4691_vm0, %v4690_v2  ;;  %4502 = vmatmul.mubr.f32.vlgmr.msra.gmra.mxu0 %v4927_v58 }
 0x13f   : > { %4509 = vmatmul.mubr.f32.vlgmr.msra.gmra.mxu1 %v4927_v58  ;;  %4511 = vmatprep.subr.mxu0 %v4690_v2 }
 0x140   : > { %4518 = vmatprep.subr.mxu1 %v4690_v2  ;;  %4512 = vmatpush3.msra.mxu0 %v4744_v3 }
 0x141   : > { %4519 = vmatpush3.msra.mxu1 %v4785_v14  ;;  %4513 = vmatprep.subr.mxu0 %v4690_v2 }
 0x142   : > { %4520 = vmatprep.subr.mxu1 %v4690_v2  ;;  %4514 = vmatpush3.msra.mxu0 %v4746_v4 }
 0x143   : > { %4515 = vmatprep.mubr.msk.f32.mxu0 %vm4691_vm0, %v4690_v2  ;;  %4521 = vmatpush3.msra.mxu1 %v4787_v15 }
 0x144   : > { %4522 = vmatprep.mubr.msk.f32.mxu1 %vm4691_vm0, %v4690_v2  ;;  %4516 = vmatmul.mubr.f32.vlgmr.msra.gmra.mxu0 %v2666_v17 }
 0x145   : > { %4523 = vmatmul.mubr.f32.vlgmr.msra.gmra.mxu1 %v4971_v1  ;;  %4525 = vmatprep.subr.mxu0 %v4690_v2 }
 0x146   : > { %4532 = vmatprep.subr.mxu1 %v4690_v2  ;;  %4526 = vmatpush3.msra.mxu0 %v4756_v6 }
 0x147   : > { %4533 = vmatpush3.msra.mxu1 %v4744_v3  ;;  %4527 = vmatprep.subr.mxu0 %v4690_v2 }
 0x148   : > { %4534 = vmatprep.subr.mxu1 %v4690_v2  ;;  %4528 = vmatpush3.msra.mxu0 %v4759_v7  ;;  %v379_v20 = vpop.f32.mrf.mxu1 }
 0x149   : > { %4529 = vmatprep.mubr.msk.f32.mxu0 %vm4691_vm0, %v4690_v2  ;;  %4535 = vmatpush3.msra.mxu1 %v4746_v4 }
 0x14a   : > { %4536 = vmatprep.mubr.msk.f32.mxu1 %vm4691_vm0, %v4690_v2  ;;  %4530 = vmatmul.mubr.f32.vlgmr.msra.gmra.mxu0 %v2663_v5  ;;  %v4314_v22 = vpop.f32.mrf.mxu1 }
 0x14b   : > { %4537 = vmatmul.mubr.f32.vlgmr.msra.gmra.mxu1 %v2664_v8  ;;  %4539 = vmatprep.subr.mxu0 %v4690_v2 }
 0x14c   : > { %4546 = vmatprep.subr.mxu1 %v4690_v2  ;;  %4540 = vmatpush3.msra.mxu0 %v4769_v10 }
 0x14d   : > { %4547 = vmatpush3.msra.mxu1 %v4744_v3  ;;  %4541 = vmatprep.subr.mxu0 %v4690_v2 }
 0x14e   : > { %4548 = vmatprep.subr.mxu1 %v4690_v2  ;;  %4542 = vmatpush3.msra.mxu0 %v4773_v11  ;;  %v530_v24 = vpop.f32.mrf.mxu1 }
 0x14f   : > { %4543 = vmatprep.mubr.msk.f32.mxu0 %vm4691_vm0, %v4690_v2  ;;  %4549 = vmatpush3.msra.mxu1 %v4746_v4 }
 0x150   : > { %4550 = vmatprep.mubr.msk.f32.mxu1 %vm4691_vm0, %v4690_v2  ;;  %4544 = vmatmul.mubr.f32.vlgmr.msra.gmra.mxu0 %v4971_v1  ;;  %v298_v25 = vpop.f32.mrf.mxu0  ;;  %v4328_v26 = vpop.f32.mrf.mxu1 }
 0x151   : > { %4551 = vmatmul.mubr.f32.vlgmr.msra.gmra.mxu1 %v4971_v1  ;;  %4553 = vmatprep.subr.mxu0 %v4690_v2  ;;  %v380_v27 = vadd.f32 %v379_v20, %v298_v25 }
 0x152   : > { %4560 = vmatprep.subr.mxu1 %v4690_v2  ;;  %4554 = vmatpush3.msra.mxu0 %v4744_v3  ;;  %v4307_v29 = vpop.f32.mrf.mxu0 }
 0x153   : > { %4561 = vmatpush3.msra.mxu1 %v4785_v14  ;;  %4555 = vmatprep.subr.mxu0 %v4690_v2 }
 0x154   : > { %4562 = vmatprep.subr.mxu1 %v4690_v2  ;;  %4556 = vmatpush3.msra.mxu0 %v4746_v4  ;;  %v455_v30 = vpop.f32.mrf.mxu0 }
 0x155   : > { %4557 = vmatprep.mubr.msk.f32.mxu0 %vm4691_vm0, %v4690_v2  ;;  %4563 = vmatpush3.msra.mxu1 %v4787_v15  ;;  %v456_v31 = vadd.f32 %v455_v30, %v380_v27 }
 0x156   : > { %4564 = vmatprep.mubr.msk.f32.mxu1 %vm4691_vm0, %v4690_v2  ;;  %4558 = vmatmul.mubr.f32.vlgmr.msra.gmra.mxu0 %v3155_v28  ;;  %v4321_v32 = vpop.f32.mrf.mxu0  ;;  %v680_v33 = vpop.f32.mrf.mxu1 }
 0x157   : > { %4565 = vmatmul.mubr.f32.vlgmr.msra.gmra.mxu1 %v5014_v18  ;;  %4567 = vmatprep.subr.mxu0 %v4690_v2  ;;  %v531_v34 = vadd.f32 %v530_v24, %v456_v31 }
 0x158   : > { %4574 = vmatprep.subr.mxu1 %v4690_v2  ;;  %4568 = vmatpush3.msra.mxu0 %v4756_v6  ;;  %v607_v35 = vpop.f32.mrf.mxu0  ;;  %v4342_v36 = vpop.f32.mrf.mxu1 }
 0x159   : > { %4575 = vmatpush3.msra.mxu1 %v4744_v3  ;;  %4569 = vmatprep.subr.mxu0 %v4690_v2  ;;  %v608_v37 = vadd.f32 %v607_v35, %v531_v34 }
 0x15a   : > { %4576 = vmatprep.subr.mxu1 %v4690_v2  ;;  %4570 = vmatpush3.msra.mxu0 %v4759_v7  ;;  %v4335_v38 = vpop.f32.mrf.mxu0 }
 0x15b   : > { %4571 = vmatprep.mubr.msk.f32.mxu0 %vm4691_vm0, %v4690_v2  ;;  %4577 = vmatpush3.msra.mxu1 %v4746_v4  ;;  %v681_v39 = vadd.f32 %v680_v33, %v608_v37 }
 0x15c   : > { %4578 = vmatprep.mubr.msk.f32.mxu1 %vm4691_vm0, %v4690_v2  ;;  %4572 = vmatmul.mubr.f32.vlgmr.msra.gmra.mxu0 %v5025_v19 }
 0x15d   : > { %4579 = vmatmul.mubr.f32.vlgmr.msra.gmra.mxu1 %v3153_v21  ;;  %4581 = vmatprep.subr.mxu0 %v4690_v2  ;;  %1149 = vst.msk [vmem:[%s5076_s26] sm:$0xff] %vm1148_vm2, %v681_v39 }
 0x15e   : > { %4588 = vmatprep.subr.mxu1 %v4690_v2  ;;  %4582 = vmatpush3.msra.mxu0 %v4769_v10 }
 0x15f   : > { %4589 = vmatpush3.msra.mxu1 %v4744_v3  ;;  %4583 = vmatprep.subr.mxu0 %v4690_v2 }
 0x160   : > { %4590 = vmatprep.subr.mxu1 %v4690_v2  ;;  %4584 = vmatpush3.msra.mxu0 %v4773_v11 }
 0x161   : > { %4585 = vmatprep.mubr.msk.f32.mxu0 %vm4691_vm0, %v4690_v2  ;;  %4591 = vmatpush3.msra.mxu1 %v4746_v4 }
 0x162   : > { %4592 = vmatprep.mubr.msk.f32.mxu1 %vm4691_vm0, %v4690_v2  ;;  %4586 = vmatmul.mubr.f32.vlgmr.msra.gmra.mxu0 %v5014_v18 }
 0x163   : > { %4593 = vmatmul.mubr.f32.vlgmr.msra.gmra.mxu1 %v5014_v18  ;;  %4602 = vmatprep.subr.mxu1 %v4690_v2 }
 0x164   : > { %4603 = vmatpush3.msra.mxu1 %v4785_v14  ;;  %4606 = vmatprep.mubr.msk.f32.mxu1 %vm4691_vm0, %v4690_v2 }
 0x165   : > { %4604 = vmatprep.subr.mxu1 %v4690_v2  ;;  %4595 = vmatprep.subr.mxu0 %v4690_v2 }
 0x166   : > { %4605 = vmatpush3.msra.mxu1 %v4787_v15  ;;  %4596 = vmatpush3.msra.mxu0 %v4744_v3 }
 0x167   : > { %4616 = vmatprep.subr.mxu1 %v4690_v2  ;;  %4597 = vmatprep.subr.mxu0 %v4690_v2 }
 0x168   : > { %4598 = vmatpush3.msra.mxu0 %v4746_v4  ;;  %4599 = vmatprep.mubr.msk.f32.mxu0 %vm4691_vm0, %v4690_v2 }
 0x169   : > { %4609 = vmatprep.subr.mxu0 %v4690_v2  ;;  %1153 = vrot.lane.b32.xlu0 %v681_v39, %s4694_s27 }
 0x170   : > { %v3545_v14 = vpop.permute.xlu1 %3544 }
 0x171   : > { %v3546_v40 = vsel %vm221_vm1, %v3545_v14, 0 }
 0x172   : > { %v3615_v15 = vand.u32 4294901760, %v3546_v40 }
 0x174   : > { %v3616_v41 = vsub.f32 %v3546_v40, %v3615_v15  ;;  %4607 = vmatmul.mubr.f32.vlgmr.msra.gmra.mxu1 %v3615_v15 }
 0x175   : > { %4617 = vmatpush3.msra.mxu1 %v4744_v3  ;;  %4620 = vmatprep.mubr.msk.f32.mxu1 %vm4691_vm0, %v4690_v2 }
 0x176   : > { %v3617_v42 = vand.u32 4294901760, %v3616_v41  ;;  %4618 = vmatprep.subr.mxu1 %v4690_v2 }
 0x177   : > { %4619 = vmatpush3.msra.mxu1 %v4746_v4 }
 0x178   : > { %v3618_v43 = vsub.f32 %v3616_v41, %v3617_v42  ;;  %4621 = vmatmul.mubr.f32.vlgmr.msra.gmra.mxu1 %v3617_v42  ;;  %4630 = vmatprep.subr.mxu1 %v4690_v2 }
 0x179   : > { %4631 = vmatpush3.msra.mxu1 %v4744_v3  ;;  %4634 = vmatprep.mubr.msk.f32.mxu1 %vm4691_vm0, %v4690_v2 }
 0x17a   : > { %v3619_v44 = vand.u32 4294901760, %v3618_v43  ;;  %4632 = vmatprep.subr.mxu1 %v4690_v2 }
 0x17b   : > { %4633 = vmatpush3.msra.mxu1 %v4746_v4 }
 0x17c   : > { %4600 = vmatmul.mubr.f32.vlgmr.msra.gmra.mxu0 %v3619_v44  ;;  %4635 = vmatmul.mubr.f32.vlgmr.msra.gmra.mxu1 %v3615_v15 }
 0x17d   : > { %4610 = vmatpush3.msra.mxu0 %v4756_v6  ;;  %4613 = vmatprep.mubr.msk.f32.mxu0 %vm4691_vm0, %v4690_v2 }
 0x17e   : > { %4611 = vmatprep.subr.mxu0 %v4690_v2 }
 0x17f   : > { %4612 = vmatpush3.msra.mxu0 %v4759_v7 }
 0x180   : > { %4623 = vmatprep.subr.mxu0 %v4690_v2  ;;  %4614 = vmatmul.mubr.f32.vlgmr.msra.gmra.mxu0 %v3616_v41 }
 0x181   : > { %4624 = vmatpush3.msra.mxu0 %v4769_v10  ;;  %4627 = vmatprep.mubr.msk.f32.mxu0 %vm4691_vm0, %v4690_v2 }
 0x182   : > { %4625 = vmatprep.subr.mxu0 %v4690_v2 }
 0x183   : > { %4626 = vmatpush3.msra.mxu0 %v4773_v11 }
 0x184   : > { %4628 = vmatmul.mubr.f32.vlgmr.msra.gmra.mxu0 %v3615_v15 }
 0x1bb   : > { %v843_v3 = vpop.f32.mrf.mxu1 }
 0x1bd   : > { %v4356_v4 = vpop.f32.mrf.mxu1 }
 0x1bf   : > { %v994_v6 = vpop.f32.mrf.mxu1 }
 0x1c1   : > { %v4370_v45 = vpop.f32.mrf.mxu1 }
 0x1c3   : > { %v762_v46 = vpop.f32.mrf.mxu0  ;;  %v1144_v7 = vpop.f32.mrf.mxu1 }
 0x1c4   : > { %v844_v49 = vadd.f32 %v843_v3, %v762_v46 }
 0x1c5   : > { %v4349_v47 = vpop.f32.mrf.mxu0  ;;  %v4384_v48 = vpop.f32.mrf.mxu1 }
 0x1c7   : > { %v919_v50 = vpop.f32.mrf.mxu0 }
 0x1c8   : > { %v920_v10 = vadd.f32 %v919_v50, %v844_v49 }
 0x1c9   : > { %v4363_v51 = vpop.f32.mrf.mxu0 }
 0x1ca   : > { %v995_v52 = vadd.f32 %v994_v6, %v920_v10 }
 0x1cb   : > { %v1071_v53 = vpop.f32.mrf.mxu0 }
 0x1cc   : > { %v1072_v54 = vadd.f32 %v1071_v53, %v995_v52 }
 0x1cd   : > { %v4377_v2 = vpop.f32.mrf.mxu0 }
 0x1ce   : > { %v1145_v55 = vadd.f32 %v1144_v7, %v1072_v54  ;;  %v1332_v11 = vpop.f32.mrf.mxu1 }
 0x1cf   : > { %v1251_v56 = vpop.f32.mrf.mxu0 }
 0x1d0   : > { %4135 = vst.msk [vmem:[%s5076_s26 + $0x20] sm:$0xff] %vm1148_vm2, %v1145_v55  ;;  %1159 = vrot.lane.b32.xlu1 %v1145_v55, %s4694_s27  ;;  %v4398_v57 = vpop.f32.mrf.mxu1  ;;  %v1333_v58 = vadd.f32 %v1332_v11, %v1251_v56 }
 0x1d1   : > { %v4391_v59 = vpop.f32.mrf.mxu0 }
 0x1d4   : > { %v1408_v60 = vpop.f32.mrf.mxu0 }
 0x1d5   : > { %v1409_v61 = vadd.f32 %v1408_v60, %v1333_v58  ;;  %v1483_v62 = vpop.f32.mrf.mxu1 }
 0x1d6   : > { %v4405_v63 = vpop.f32.mrf.mxu0 }
 0x1d7   : > { %v1484_v0 = vadd.f32 %v1483_v62, %v1409_v61  ;;  %v4412_v1 = vpop.f32.mrf.mxu1 }
 0x1da   : > { %v1560_v5 = vpop.f32.mrf.mxu0 }
 0x1db   : > { %v1561_v8 = vadd.f32 %v1560_v5, %v1484_v0  ;;  %v1633_v9 = vpop.f32.mrf.mxu1  ;;  %v1154_v12 = vpop.permute.xlu0 %1153 }
 0x1dc   : > { %v4419_v13 = vpop.f32.mrf.mxu0  ;;  %4136 = vst.msk [vmem:[%s5076_s26 + $0x40] sm:$0xff] %vm1148_vm2, %v1154_v12 }
 0x1dd   : > { %v1634_v16 = vadd.f32 %v1633_v9, %v1561_v8  ;;  %v4426_v17 = vpop.f32.mrf.mxu1 }
 0x1df   : > { %4139 = vst.msk [vmem:[%s5076_s26 + $0x8] sm:$0xff] %vm1148_vm2, %v1634_v16  ;;  %2106 = vrot.lane.b32.xlu0 %v1634_v16, %s4694_s27 }
 0x1e0   : > { %v1715_v18 = vpop.f32.mrf.mxu0 }
 0x1e1   : > { %v1796_v19 = vpop.f32.mrf.mxu1 }
 0x1e2   : > { %v4433_v20 = vpop.f32.mrf.mxu0  ;;  %v1797_v21 = vadd.f32 %v1796_v19, %v1715_v18 }
 0x1e3   : > { %v4440_v22 = vpop.f32.mrf.mxu1 }
 0x1e6   : > { %v1872_v23 = vpop.f32.mrf.mxu0 }
 0x1e7   : > { %v1873_v24 = vadd.f32 %v1872_v23, %v1797_v21  ;;  %v1947_v25 = vpop.f32.mrf.mxu1 }
 0x1e8   : > { %v4447_v26 = vpop.f32.mrf.mxu0 }
 0x1e9   : > { %v1948_v27 = vadd.f32 %v1947_v25, %v1873_v24  ;;  %v4454_v28 = vpop.f32.mrf.mxu1 }
 0x1ec   : > { %v2024_v29 = vpop.f32.mrf.mxu0 }
 0x1ed   : > { %v2025_v30 = vadd.f32 %v2024_v29, %v1948_v27  ;;  %v2097_v31 = vpop.f32.mrf.mxu1 }
 0x1ee   : > { %v4461_v32 = vpop.f32.mrf.mxu0 }
 0x1ef   : > { %v2098_v33 = vadd.f32 %v2097_v31, %v2025_v30  ;;  %v4468_v34 = vpop.f32.mrf.mxu1 }
 0x1f1   : > { %4140 = vst.msk [vmem:[%s5076_s26 + $0x28] sm:$0xff] %vm1148_vm2, %v2098_v33  ;;  %2112 = vrot.lane.b32.xlu1 %v2098_v33, %s4694_s27 }
 0x1f2   : > { %v2204_v35 = vpop.f32.mrf.mxu0 }
 0x1f3   : > { %v2285_v36 = vpop.f32.mrf.mxu1 }
 0x1f4   : > { %v4475_v37 = vpop.f32.mrf.mxu0  ;;  %v2286_v38 = vadd.f32 %v2285_v36, %v2204_v35 }
 0x1f5   : > { %v4482_v39 = vpop.f32.mrf.mxu1 }
 0x1f8   : > { %v2361_v14 = vpop.f32.mrf.mxu0 }
 0x1f9   : > { %v2362_v40 = vadd.f32 %v2361_v14, %v2286_v38  ;;  %v2436_v15 = vpop.f32.mrf.mxu1 }
 0x1fa   : > { %v4489_v41 = vpop.f32.mrf.mxu0 }
 0x1fb   : > { %v2437_v42 = vadd.f32 %v2436_v15, %v2362_v40  ;;  %v4496_v43 = vpop.f32.mrf.mxu1 }
 0x1fe   : > { %v2513_v44 = vpop.f32.mrf.mxu0 }
 0x1ff   : > { %v2514_v3 = vadd.f32 %v2513_v44, %v2437_v42  ;;  %v2586_v4 = vpop.f32.mrf.mxu1 }
 0x200   : > { %v4503_v6 = vpop.f32.mrf.mxu0 }
 0x201   : > { %v2587_v45 = vadd.f32 %v2586_v4, %v2514_v3  ;;  %v4510_v46 = vpop.f32.mrf.mxu1 }
 0x203   : > { %4144 = vst.msk [vmem:[%s5076_s26 + $0x10] sm:$0xff] %vm1148_vm2, %v2587_v45  ;;  %3059 = vrot.lane.b32.xlu0 %v2587_v45, %s4694_s27 }
 0x204   : > { %v2668_v7 = vpop.f32.mrf.mxu0 }
 0x205   : > { %v2749_v47 = vpop.f32.mrf.mxu1 }
 0x206   : > { %v4517_v48 = vpop.f32.mrf.mxu0  ;;  %v2750_v49 = vadd.f32 %v2749_v47, %v2668_v7 }
 0x207   : > { %v4524_v50 = vpop.f32.mrf.mxu1 }
 0x20a   : > { %v2825_v10 = vpop.f32.mrf.mxu0 }
 0x20b   : > { %v2826_v51 = vadd.f32 %v2825_v10, %v2750_v49  ;;  %v2900_v52 = vpop.f32.mrf.mxu1 }
 0x20c   : > { %v4531_v53 = vpop.f32.mrf.mxu0 }
 0x20d   : > { %v2901_v54 = vadd.f32 %v2900_v52, %v2826_v51  ;;  %v4538_v2 = vpop.f32.mrf.mxu1 }
 0x210   : > { %v2977_v55 = vpop.f32.mrf.mxu0 }
 0x211   : > { %v2978_v11 = vadd.f32 %v2977_v55, %v2901_v54  ;;  %v3050_v56 = vpop.f32.mrf.mxu1 }
 0x212   : > { %v4545_v57 = vpop.f32.mrf.mxu0 }
 0x213   : > { %v3051_v58 = vadd.f32 %v3050_v56, %v2978_v11  ;;  %v4552_v59 = vpop.f32.mrf.mxu1 }
 0x215   : > { %4145 = vst.msk [vmem:[%s5076_s26 + $0x30] sm:$0xff] %vm1148_vm2, %v3051_v58  ;;  %3065 = vrot.lane.b32.xlu1 %v3051_v58, %s4694_s27 }
 0x216   : > { %v3157_v60 = vpop.f32.mrf.mxu0 }
 0x217   : > { %v3238_v61 = vpop.f32.mrf.mxu1 }
 0x218   : > { %v4559_v62 = vpop.f32.mrf.mxu0  ;;  %v3239_v63 = vadd.f32 %v3238_v61, %v3157_v60 }
 0x219   : > { %v4566_v0 = vpop.f32.mrf.mxu1 }
 0x21c   : > { %v3314_v1 = vpop.f32.mrf.mxu0 }
 0x21d   : > { %v3315_v5 = vadd.f32 %v3314_v1, %v3239_v63  ;;  %v3389_v8 = vpop.f32.mrf.mxu1 }
 0x21e   : > { %v4573_v9 = vpop.f32.mrf.mxu0 }
 0x21f   : > { %v3390_v12 = vadd.f32 %v3389_v8, %v3315_v5  ;;  %v4580_v13 = vpop.f32.mrf.mxu1 }
 0x222   : > { %v3466_v16 = vpop.f32.mrf.mxu0 }
 0x223   : > { %v3467_v17 = vadd.f32 %v3466_v16, %v3390_v12  ;;  %v3539_v18 = vpop.f32.mrf.mxu1 }
 0x224   : > { %v4587_v19 = vpop.f32.mrf.mxu0 }
 0x225   : > { %v3540_v20 = vadd.f32 %v3539_v18, %v3467_v17  ;;  %v4594_v21 = vpop.f32.mrf.mxu1 }
 0x227   : > { %4149 = vst.msk [vmem:[%s5076_s26 + $0x18] sm:$0xff] %vm1148_vm2, %v3540_v20  ;;  %4012 = vrot.lane.b32.xlu0 %v3540_v20, %s4694_s27 }
 0x234   : > { %v3702_v22 = vpop.f32.mrf.mxu1 }
 0x236   : > { %v4608_v23 = vpop.f32.mrf.mxu1 }
 0x238   : > { %v3853_v24 = vpop.f32.mrf.mxu1 }
 0x23a   : > { %v4622_v25 = vpop.f32.mrf.mxu1 }
 0x23c   : > { %v3621_v26 = vpop.f32.mrf.mxu0  ;;  %v4003_v27 = vpop.f32.mrf.mxu1 }
 0x23d   : > { %v3703_v30 = vadd.f32 %v3702_v22, %v3621_v26 }
 0x23e   : > { %v4601_v28 = vpop.f32.mrf.mxu0  ;;  %v4636_v29 = vpop.f32.mrf.mxu1 }
 0x240   : > { %v3778_v31 = vpop.f32.mrf.mxu0 }
 0x241   : > { %v3779_v32 = vadd.f32 %v3778_v31, %v3703_v30 }
 0x242   : > { %v1160_v33 = vpop.permute.xlu1 %1159  ;;  %v4615_v34 = vpop.f32.mrf.mxu0 }
 0x243   : > { %4137 = vst.msk [vmem:[%s5076_s26 + $0x60] sm:$0xff] %vm1148_vm2, %v1160_v33  ;;  %v3854_v35 = vadd.f32 %v3853_v24, %v3779_v32 }
 0x244   : > { %v3930_v36 = vpop.f32.mrf.mxu0 }
 0x245   : > { %v3931_v37 = vadd.f32 %v3930_v36, %v3854_v35 }
 0x246   : > { %v4629_v38 = vpop.f32.mrf.mxu0 }
 0x247   : > { %v4004_v39 = vadd.f32 %v4003_v27, %v3931_v37 }
 0x249   : > { %4150 = vst.msk [vmem:[%s5076_s26 + $0x38] sm:$0xff] %vm1148_vm2, %v4004_v39  ;;  %4018 = vrot.lane.b32.xlu1 %v4004_v39, %s4694_s27 }
 0x251   : > { %v2107_v14 = vpop.permute.xlu0 %2106 }
 0x252   : > { %4141 = vst.msk [vmem:[%s5076_s26 + $0x48] sm:$0xff] %vm1148_vm2, %v2107_v14 }
 0x263   : > { %v2113_v40 = vpop.permute.xlu1 %2112 }
 0x264   : > { %4142 = vst.msk [vmem:[%s5076_s26 + $0x68] sm:$0xff] %vm1148_vm2, %v2113_v40 }
 0x275   : > { %v3060_v15 = vpop.permute.xlu0 %3059 }
 0x276   : > { %4146 = vst.msk [vmem:[%s5076_s26 + $0x50] sm:$0xff] %vm1148_vm2, %v3060_v15 }
 0x287   : > { %v3066_v41 = vpop.permute.xlu1 %3065 }
 0x288   : > { %4147 = vst.msk [vmem:[%s5076_s26 + $0x70] sm:$0xff] %vm1148_vm2, %v3066_v41 }
 0x299   : > { %v4013_v42 = vpop.permute.xlu0 %4012 }
 0x29a   : > { %4151 = vst.msk [vmem:[%s5076_s26 + $0x58] sm:$0xff] %vm1148_vm2, %v4013_v42 }
 0x2bb   : > { %v4019_v43 = vpop.permute.xlu1 %4018 }
 0x2bc   : > { %4152 = vst.msk [vmem:[%s5076_s26 + $0x78] sm:$0xff] %vm1148_vm2, %v4019_v43 }
 0x2bd PF: > { %s12_s11 = sadd.s32 1, %s4688_s11   ;;  %s5189_s9 = smov %s4684_s10 }
 0x2be   : > { %p9_p5 = scmp.ge.s32.totalorder %s12_s11, 4   ;;  %s5190_s10 = smov %s5192_s12 }
 0x2c0   :  { %11 = sbr.rel (!%p9_p5) target bundleno = 2 (0x2), region = 76 }

</bundles_post_ra>
